<compile_context>
chip_gen: v6e
topology: v6e:2x2x1
jax: 0.10.0
libtpu: 0.0.40
codegen_flags: <defaults>
</compile_context>

<pallas_src>
import functools

import jax
import jax.numpy as jnp
import numpy as np
from jax.experimental import pallas as pl
from jax.experimental.pallas import tpu as pltpu

BN_EPS = 1e-5
LANES = 128


def _round_up(x, m):
    return (x + m - 1) // m * m


def _choose_tile(dim, preferred, align):
    """Largest sensible tile: whole (aligned) dim if small, else `preferred`."""
    if dim <= preferred:
        return _round_up(dim, align)
    return preferred  # preferred is a multiple of `align`


def _vmem_limit_bytes():
    """Scoped-VMEM budget per generation: ~40 MiB on v7x (64 MiB physical),
    64 MiB on v5e/v6e (128 MiB physical; raises v5e's 16 MiB scoped default)."""
    try:
        cap = int(pltpu.get_tpu_info().vmem_capacity_bytes)
    except Exception:
        cap = 64 << 20  # conservative (v7x-sized)
    return int(min(cap * 5 // 8, 64 << 20))


# --------------------------------------------------------------------------
# Fused tiled "spmm":  out = adj @ x   (bf16 MXU operands, f32 accumulation)
# --------------------------------------------------------------------------
def _spmm_kernel(adj_ref, x_ref, out_ref, *, tk, x_resident, compute_dtype):
    k = pl.program_id(1)

    @pl.when(k == 0)
    def _():
        out_ref[...] = jnp.zeros_like(out_ref)

    a = adj_ref[...]
    if a.dtype != compute_dtype:          # static branch; cast hides under DMA
        a = a.astype(compute_dtype)

    if x_resident:                         # x fully resident in VMEM: slice it
        off = pl.multiple_of(k * tk, tk)
        b = x_ref[pl.ds(off, tk), :]
    else:                                  # x streamed per K tile by BlockSpec
        b = x_ref[...]

    # Accumulate directly into the resident f32 output block (no scratch).
    out_ref[...] += jnp.dot(a, b, preferred_element_type=jnp.float32)


def _fused_spmm(adj_padded, x_padded, *, tm, tk, vmem_limit,
                compute_dtype=jnp.bfloat16, x_resident_max_bytes=6 << 20):
    n_pad, k_pad = adj_padded.shape
    k_pad2, d_pad = x_padded.shape
    assert k_pad == k_pad2 and n_pad % tm == 0 and k_pad % tk == 0
    assert d_pad % LANES == 0

    grid = (n_pad // tm, k_pad // tk)

    x_bytes = k_pad * d_pad * jnp.dtype(x_padded.dtype).itemsize
    x_resident = x_bytes <= x_resident_max_bytes
    if x_resident:
        # Constant block index => DMA'd once, never re-streamed per row tile.
        x_spec = pl.BlockSpec((k_pad, d_pad), lambda i, k: (0, 0))
        x_read_bytes = x_bytes
    else:
        x_spec = pl.BlockSpec((tk, d_pad), lambda i, k: (k, 0))
        x_read_bytes = grid[0] * x_bytes

    adj_bytes = n_pad * k_pad * jnp.dtype(adj_padded.dtype).itemsize
    out_bytes = n_pad * d_pad * 4

    kernel = functools.partial(_spmm_kernel, tk=tk, x_resident=x_resident,
                               compute_dtype=compute_dtype)
    return pl.pallas_call(
        kernel,
        out_shape=jax.ShapeDtypeStruct((n_pad, d_pad), jnp.float32),
        grid_spec=pltpu.PrefetchScalarGridSpec(
            num_scalar_prefetch=0,
            grid=grid,
            in_specs=[pl.BlockSpec((tm, tk), lambda i, k: (i, k)), x_spec],
            out_specs=pl.BlockSpec((tm, d_pad), lambda i, k: (i, 0))),
        compiler_params=pltpu.CompilerParams(
            dimension_semantics=("parallel", "arbitrary"),
            vmem_limit_bytes=vmem_limit),
        cost_estimate=pl.CostEstimate(
            flops=2 * n_pad * k_pad * d_pad,
            transcendentals=0,
            bytes_accessed=adj_bytes + x_read_bytes + out_bytes),
    )(adj_padded, x_padded)


# --------------------------------------------------------------------------
# One-time graph preparation (the adjacency is static across training steps)
# --------------------------------------------------------------------------
def prepare_lightgcn_graph(u2u_adj, beh_u2i_fold_list, beh_i2u_fold_list,
                           i2i_adj, *, embed_dim, u2u_flag=True, i2i_flag=True,
                           compute_dtype=jnp.bfloat16,
                           tm_pref=1024, tk_pref=4096):
    """Fuse [self | cross] adjacency per side, pad to tile multiples, cast to
    the MXU compute dtype.  Do this ONCE at model setup, not per forward."""
    u2i_full = jnp.concatenate(list(beh_u2i_fold_list), axis=0)  # (n_users, n_items)
    i2u_full = jnp.concatenate(list(beh_i2u_fold_list), axis=0)  # (n_items, n_users)
    d_pad = _round_up(embed_dim, LANES)
    vmem_limit = _vmem_limit_bytes()

    def make_side(self_adj, cross_adj, self_flag):
        blocks = [self_adj, cross_adj] if self_flag else [cross_adj]
        adj = jnp.concatenate(blocks, axis=1)
        n, k = adj.shape
        tm = _choose_tile(n, tm_pref, 16)     # 16-row align (bf16 sublane pack)
        tk = _choose_tile(k, tk_pref, 128)    # lane-aligned reduction tile
        n_pad = _round_up(n, tm)
        k_pad = _round_up(k, tk)
        adj = adj.astype(compute_dtype)
        if (n_pad, k_pad) != (n, k):
            adj = jnp.pad(adj, ((0, n_pad - n), (0, k_pad - k)))
        return dict(adj=adj, n=n, tm=tm, tk=tk, k_pad=k_pad, self_flag=self_flag)

    return dict(user=make_side(u2u_adj, u2i_full, u2u_flag),
                item=make_side(i2i_adj, i2u_full, i2i_flag),
                embed_dim=embed_dim, d_pad=d_pad,
                compute_dtype=compute_dtype, vmem_limit=vmem_limit)


# --------------------------------------------------------------------------
# BatchNorm1d (training-mode normalization) in plain XLA: stats + normalize
# fuse into one pass; negligible next to the adjacency stream.
# --------------------------------------------------------------------------
def _batch_norm(x, gamma, beta):
    # TODO(synk): running_mean/running_var (momentum) buffer updates are not
    # modeled; this matches PyTorch training-mode normalization only.
    mean = jnp.mean(x, axis=0, keepdims=True)
    var = jnp.mean(jnp.square(x - mean), axis=0, keepdims=True)
    return (x - mean) * jax.lax.rsqrt(var + BN_EPS) * gamma[None, :] + beta[None, :]


# --------------------------------------------------------------------------
# LightGCN_Layer forward
# --------------------------------------------------------------------------
def lightgcn_layer(user_embedding, item_embedding, graph, gamma, beta, *,
                   batch_norm=True):
    d = graph['embed_dim']
    d_pad = graph['d_pad']
    cdt = graph['compute_dtype']

    def side(side_g, self_emb, cross_emb):
        xs = [self_emb, cross_emb] if side_g['self_flag'] else [cross_emb]
        x = jnp.concatenate(xs, axis=0).astype(cdt)
        # Lane-dense RHS/output: pad embed dim to 128 lanes; pad K rows to the
        # adjacency's padded reduction size (padded adjacency columns are zero).
        x = jnp.pad(x, ((0, side_g['k_pad'] - x.shape[0]), (0, d_pad - d)))
        out = _fused_spmm(side_g['adj'], x, tm=side_g['tm'], tk=side_g['tk'],
                          vmem_limit=graph['vmem_limit'], compute_dtype=cdt)
        return out[:side_g['n'], :d]

    user_agg = side(graph['user'], user_embedding, item_embedding)
    item_agg = side(graph['item'], item_embedding, user_embedding)

    if batch_norm:
        user_agg = _batch_norm(user_agg, gamma, beta)
        item_agg = _batch_norm(item_agg, gamma, beta)
    return user_agg, item_agg


def lightgcn_layer_forward(user_embedding, item_embedding, u2u_adj,
                           beh_u2i_fold_list, beh_i2u_fold_list, i2i_adj,
                           gamma, beta, *, sparse_graph_flag=True,
                           u2u_flag=True, i2i_flag=True, batch_norm=True,
                           compute_dtype=jnp.bfloat16):
    """Convenience wrapper matching the PyTorch forward signature.  In a
    training loop, call prepare_lightgcn_graph() once and reuse the result."""
    assert sparse_graph_flag, "only the sparse_graph_flag=True path is defined"
    graph = prepare_lightgcn_graph(
        u2u_adj, beh_u2i_fold_list, beh_i2u_fold_list, i2i_adj,
        embed_dim=user_embedding.shape[1], u2u_flag=u2u_flag,
        i2i_flag=i2i_flag, compute_dtype=compute_dtype)
    return lightgcn_layer(user_embedding, item_embedding, graph, gamma, beta,
                          batch_norm=batch_norm)


# --------------------------------------------------------------------------
# Reference (plain JAX, same bf16-operand / f32-accumulate arithmetic)
# --------------------------------------------------------------------------
def _reference(user_emb, item_emb, u2u_adj, u2i_folds, i2u_folds, i2i_adj,
               gamma, beta, compute_dtype):
    def mm(a, b):
        return jnp.dot(a.astype(compute_dtype), b.astype(compute_dtype),
                       preferred_element_type=jnp.float32)

    def bn(x):
        mean = x.mean(axis=0, keepdims=True)
        var = ((x - mean) ** 2).mean(axis=0, keepdims=True)
        return (x - mean) / jnp.sqrt(var + BN_EPS) * gamma + beta

    i2u_agg = jnp.concatenate([mm(f, item_emb) for f in u2i_folds], axis=0)
    u2i_agg = jnp.concatenate([mm(f, user_emb) for f in i2u_folds], axis=0)
    u = mm(u2u_adj, user_emb) + i2u_agg
    it = mm(i2i_adj, item_emb) + u2i_agg
    return bn(u), bn(it)


if __name__ == "__main__":
    n_users, n_items, embed_dim = 64, 96, 32
    key = jax.random.PRNGKey(0)
    ks = jax.random.split(key, 8)

    user_emb = jax.random.normal(ks[0], (n_users, embed_dim), jnp.float32)
    item_emb = jax.random.normal(ks[1], (n_items, embed_dim), jnp.float32)

    def sparse_dense(k, shape, density=0.2):
        k1, k2 = jax.random.split(k)
        vals = jax.random.uniform(k1, shape, jnp.float32)
        mask = (jax.random.uniform(k2, shape) < density).astype(jnp.float32)
        return vals * mask

    u2u_adj = sparse_dense(ks[2], (n_users, n_users))
    i2i_adj = sparse_dense(ks[3], (n_items, n_items))
    u2i_full = sparse_dense(ks[4], (n_users, n_items))
    i2u_full = sparse_dense(ks[5], (n_items, n_users))

    # Row folds of the bipartite adjacencies, as produced by the module.
    beh_u2i_fold_list = [u2i_full[:32], u2i_full[32:]]
    beh_i2u_fold_list = [i2u_full[:32], i2u_full[32:64], i2u_full[64:]]

    # BatchNorm1d(embed_dim) default init: weight=1, bias=0.
    gamma = jnp.ones((embed_dim,), jnp.float32)
    beta = jnp.zeros((embed_dim,), jnp.float32)

    compute_dtype = jnp.bfloat16

    # One-time setup (static graph), then the per-step forward.
    graph = prepare_lightgcn_graph(
        u2u_adj, beh_u2i_fold_list, beh_i2u_fold_list, i2i_adj,
        embed_dim=embed_dim, u2u_flag=True, i2i_flag=True,
        compute_dtype=compute_dtype)
    jax.block_until_ready((graph['user']['adj'], graph['item']['adj']))

    user_out, item_out = lightgcn_layer(user_emb, item_emb, graph, gamma, beta,
                                        batch_norm=True)
    jax.block_until_ready((user_out, item_out))

    ref_u, ref_i = _reference(user_emb, item_emb, u2u_adj, beh_u2i_fold_list,
                              beh_i2u_fold_list, i2i_adj, gamma, beta,
                              compute_dtype)
    np.testing.assert_allclose(np.asarray(user_out), np.asarray(ref_u),
                               rtol=5e-3, atol=5e-3)
    np.testing.assert_allclose(np.asarray(item_out), np.asarray(ref_i),
                               rtol=5e-3, atol=5e-3)

    print("KERNEL_OK")
</pallas_src>

<mosaic_0001>
module attributes {stable_mosaic.version = 11 : i64} {
  func.func @_spmm_kernel(%arg0: i32, %arg1: i32, %arg2: memref<64x256xbf16, #tpu.memory_space<vmem>>, %arg3: memref<256x128xbf16, #tpu.memory_space<vmem>>, %arg4: memref<64x128xf32, #tpu.memory_space<vmem>>) attributes {dimension_semantics = [#tpu.dimension_semantics<parallel>, #tpu.dimension_semantics<arbitrary>], iteration_bounds = array<i64: 1, 1>, scalar_prefetch = 0 : i64, scratch_operands = 0 : i64, tpu.core_type = #tpu.core_type<tc>, window_params = [{transform_indices = @transform_0, window_bounds = array<i64: 64, 256>}, {pipeline_mode = #tpu.pipeline_mode<synchronous>, transform_indices = @transform_1, window_bounds = array<i64: 256, 128>}, {transform_indices = @transform_2, window_bounds = array<i64: 64, 128>}]} {
    %c0_i32 = arith.constant 0 : i32
    %0 = arith.cmpi eq, %arg1, %c0_i32 : i32
    %1 = arith.extui %0 : i1 to i32
    %c0_i32_0 = arith.constant 0 : i32
    %2 = arith.cmpi ne, %1, %c0_i32_0 : i32
    scf.if %2 {
      %cst_7 = arith.constant 0.000000e+00 : f32
      %12 = vector.broadcast %cst_7 : f32 to vector<64x128xf32>
      %c0_8 = arith.constant 0 : index
      %c0_9 = arith.constant 0 : index
      %13 = vector.load %arg4[%c0_8, %c0_9] : memref<64x128xf32, #tpu.memory_space<vmem>>, vector<64x128xf32>
      tpu.vector_store %arg4[%c0_8, %c0_9], %12 {strides = array<i32>} : memref<64x128xf32, #tpu.memory_space<vmem>>, vector<64x128xf32>,
    } else {
    }
    %c0 = arith.constant 0 : index
    %c0_1 = arith.constant 0 : index
    %3 = vector.load %arg2[%c0, %c0_1] : memref<64x256xbf16, #tpu.memory_space<vmem>>, vector<64x256xbf16>
    %c256_i32 = arith.constant 256 : i32
    %4 = arith.muli %arg1, %c256_i32 : i32
    %5 = tpu.assume_multiple %4, 256 : i32
    %6 = arith.index_cast %5 : i32 to index
    %c0_2 = arith.constant 0 : index
    %7 = vector.load %arg3[%6, %c0_2] : memref<256x128xbf16, #tpu.memory_space<vmem>>, vector<256x128xbf16>
    %c0_3 = arith.constant 0 : index
    %c0_4 = arith.constant 0 : index
    %8 = vector.load %arg4[%c0_3, %c0_4] : memref<64x128xf32, #tpu.memory_space<vmem>>, vector<64x128xf32>
    %cst = arith.constant dense<0.000000e+00> : vector<64x128xf32>
    %9 = tpu.matmul %3, %7, %cst {dimension_numbers = #tpu.dot_dimension_numbers<[1], [0], [0], [1], [0, 0, 1, 1], [], []>} : vector<64x256xbf16>, vector<256x128xbf16>, vector<64x128xf32> -> vector<64x128xf32>
    %10 = arith.addf %8, %9 : vector<64x128xf32>
    %c0_5 = arith.constant 0 : index
    %c0_6 = arith.constant 0 : index
    %11 = vector.load %arg4[%c0_5, %c0_6] : memref<64x128xf32, #tpu.memory_space<vmem>>, vector<64x128xf32>
    tpu.vector_store %arg4[%c0_5, %c0_6], %10 {strides = array<i32>} : memref<64x128xf32, #tpu.memory_space<vmem>>, vector<64x128xf32>,
    return
  }
  func.func @transform_0(%arg0: i32, %arg1: i32) -> (i32, i32) {
    %c0_i32 = arith.constant 0 : i32
    return %arg0, %arg1 : i32, i32
  }
  func.func @transform_1(%arg0: i32, %arg1: i32) -> (i32, i32) {
    %c0_i32 = arith.constant 0 : i32
    %c0_i32_0 = arith.constant 0 : i32
    %c0_i32_1 = arith.constant 0 : i32
    return %c0_i32, %c0_i32_0 : i32, i32
  }
  func.func @transform_2(%arg0: i32, %arg1: i32) -> (i32, i32) {
    %c0_i32 = arith.constant 0 : i32
    %c0_i32_0 = arith.constant 0 : i32
    return %arg0, %c0_i32 : i32, i32
  }
}

</mosaic_0001>

<bundles_post_ra>
// kernel: tpu_custom_call.1
= control target key start
LH: loop header
LB: loop body
LE: loop exit
PB: predicated region body
PF: predicated region fallthrough
CT: control target
= control target key end

     0   :  { %7 = vsyncpa [#allocation3], 0  ;;  %s562_s0 = inlined_call_operand.hbm [shape: bf16[64,256], index: 0, kind: input, shape index: {}]   ;;  %s563_s1 = inlined_call_operand.hbm [shape: bf16[256,128], index: 1, kind: input, shape index: {}]   ;;  %s564_s2 = inlined_call_operand.hbm [shape: f32[64,128], index: 2, kind: output, shape index: {}]  }
   0x1   :  { %8 = vsyncpa [#allocation6], 0 }
   0x2   :  { %9 = vsyncpa [#allocation4], 0  ;;  %s525_s9 = smov [#allocation2]  }
   0x3   :  { %s15_s10 = sshll.u32 %s525_s9, 4  ;;  %s16_s10 = int_to_ptr.vmem [resolvable:$true] %s15_s10 }
   0x4   :  { %s467_s11 = scalar_lea.vmem %s16_s10, 1024  ;;  %p472_p1 = scmp.lt.s32.totalorder %s16_s10, %s16_s10 }
   0x5   :  { %p468_p0 = scmp.ne.s32.totalorder %s16_s10, %s467_s11  ;;  %p473_p2 = scmp.lt.s32.totalorder %s467_s11, %s467_s11 }
   0x7   :  { %p474_p3 = por %p473_p2, %p472_p1 }
   0x9   :  { %p475_p4 = pnand %p474_p3, %p468_p0 }
   0xb   :  { %478 = shalt.err (!%p475_p4)
}
   0xc   :  { %s526_s12 = smov 128   ;;  %s527_s13 = smov 8  }
   0xd   :  { %21 = dma.hbm_to_vmem [thread:$0]  %s562_s0, 1024, %s16_s10, [#allocation3], %s526_s12, %s526_s12, %s527_s13  }
   0xe   :  { %s528_s16 = smov [#allocation5]  }
   0xf   :  { %s27_s17 = sshll.u32 %s528_s16, 4  ;;  %s28_s17 = int_to_ptr.vmem [resolvable:$true] %s27_s17 }
  0x10   :  { %s487_s18 = scalar_lea.vmem %s28_s17, 2048  ;;  %p492_p6 = scmp.lt.s32.totalorder %s28_s17, %s28_s17 }
  0x11   :  { %p488_p5 = scmp.ne.s32.totalorder %s28_s17, %s487_s18  ;;  %p493_p7 = scmp.lt.s32.totalorder %s487_s18, %s487_s18 }
  0x13   :  { %p494_p8 = por %p493_p7, %p492_p6 }
  0x15   :  { %p495_p9 = pnand %p494_p8, %p488_p5 }
  0x17   :  { %498 = shalt.err (!%p495_p9)
}
  0x18   :  { %s529_s19 = smov 64   ;;  %s530_s20 = smov 4  }
  0x19   :  { %33 = dma.hbm_to_vmem [thread:$0]  %s563_s1, 2048, %s28_s17, [#allocation6], %s529_s19, %s529_s19, %s530_s20  }
  0x1a   :  { %519 = dma.done.wait [#allocation3], 1024  }
  0x1b   :  { %520 = vsyncadd [#allocation3], 4294966272 }
  0x1c   :  { %521 = dma.done.wait [#allocation6], 2048  }
  0x1d   :  { %522 = vsyncadd [#allocation6], 4294965248  ;;  %v431_v0 = vld [vmem:[#allocation5 + $0x78] sm:$0xff]   ;;  %v433_v2 = vld [vmem:[#allocation5 + $0x70] sm:$0xff]   ;;  %s531_s0 = smov [#allocation7]  }
  0x1e   :  { %v432_v1 = vld [vmem:[#allocation5 + $0x38] sm:$0xff]   ;;  %367 = vmatprep.subr.bf16.mxu0 %v431_v0  ;;  %407 = vmatprep.subr.bf16.mxu1 %v431_v0  ;;  %v434_v3 = vld [vmem:[#allocation5 + $0x30] sm:$0xff]   ;;  %v435_v4 = vld [vmem:[#allocation5 + $0x68] sm:$0xff]   ;;  %s328_s1 = sshll.u32 %s531_s0, 4  ;;  %s329_s1 = int_to_ptr.vmem [resolvable:$true] %s328_s1 }
  0x1f   :  { %368 = vmatpush3.bf16.msra.mxu0 %v432_v1  ;;  %415 = vmatpush3.bf16.msra.mxu1 %v432_v1  ;;  %v436_v5 = vld [vmem:[#allocation5 + $0x28] sm:$0xff]   ;;  %v437_v6 = vld [vmem:[#allocation5 + $0x60] sm:$0xff]   ;;  %v439_v8 = vld [vmem:[#allocation5 + $0x58] sm:$0xff]   ;;  %s499_s23 = scalar_lea.vmem %s329_s1, 1024  ;;  %p504_p11 = scmp.lt.s32.totalorder %s329_s1, %s329_s1 }
  0x20   :  { %369 = vmatprep.subr.bf16.mxu0 %v433_v2  ;;  %408 = vmatprep.subr.bf16.mxu1 %v433_v2  ;;  %v438_v7 = vld [vmem:[#allocation5 + $0x20] sm:$0xff]   ;;  %v440_v9 = vld [vmem:[#allocation5 + $0x18] sm:$0xff]   ;;  %v441_v10 = vld [vmem:[#allocation5 + $0x50] sm:$0xff]   ;;  %p500_p10 = scmp.ne.s32.totalorder %s329_s1, %s499_s23  ;;  %p505_p12 = scmp.lt.s32.totalorder %s499_s23, %s499_s23 }
  0x21   :  { %v449_v11 = vld [vmem:[#allocation2 + $0x4] ss:$8 sps:$4 sm:$0xff]   ;;  %v442_v13 = vld [vmem:[#allocation5 + $0x10] sm:$0xff]   ;;  %v447_v18 = vld [vmem:[#allocation2] ss:$8 sps:$4 sm:$0xff]  }
  0x22   :  { %v452_v12 = vld [vmem:[#allocation2 + $0x24] ss:$8 sps:$4 sm:$0xff]   ;;  %274 = vmatprep.mubr.bf16.mxu0 %v449_v11  ;;  %v450_v19 = vld [vmem:[#allocation2 + $0x20] ss:$8 sps:$4 sm:$0xff]   ;;  %v453_v20 = vld [vmem:[#allocation2 + $0x14] ss:$8 sps:$4 sm:$0xff]   ;;  %p506_p13 = por %p505_p12, %p504_p11 }
  0x23   :  { %370 = vmatpush3.bf16.msra.mxu0 %v434_v3  ;;  %416 = vmatpush3.bf16.msra.mxu1 %v434_v3  ;;  %v443_v14 = vld [vmem:[#allocation5 + $0x48] sm:$0xff]   ;;  %v445_v16 = vld [vmem:[#allocation5 + $0x40] sm:$0xff]   ;;  %v455_v21 = vld [vmem:[#allocation2 + $0x34] ss:$8 sps:$4 sm:$0xff]  }
  0x24   :  { %371 = vmatprep.subr.bf16.mxu0 %v435_v4  ;;  %409 = vmatprep.subr.bf16.mxu1 %v435_v4  ;;  %v444_v15 = vld [vmem:[#allocation5 + $0x8] sm:$0xff]   ;;  %v446_v17 = vld [vmem:[#allocation5] sm:$0xff]   ;;  %v457_v22 = vld [vmem:[#allocation2 + $0x10] ss:$8 sps:$4 sm:$0xff]   ;;  %p507_p0 = pnand %p506_p13, %p500_p10 }
  0x25   :  { %290 = vmatprep.mubr.bf16.mxu1 %v452_v12  ;;  %v458_v23 = vld [vmem:[#allocation2 + $0x30] ss:$8 sps:$4 sm:$0xff]  }
  0x27   :  { %372 = vmatpush3.bf16.msra.mxu0 %v436_v5  ;;  %417 = vmatpush3.bf16.msra.mxu1 %v436_v5 }
  0x28   :  { %373 = vmatprep.subr.bf16.mxu0 %v437_v6  ;;  %410 = vmatprep.subr.bf16.mxu1 %v437_v6 }
  0x2b   :  { %374 = vmatpush3.bf16.msra.mxu0 %v438_v7  ;;  %418 = vmatpush3.bf16.msra.mxu1 %v438_v7 }
  0x2c   :  { %375 = vmatprep.subr.bf16.mxu0 %v439_v8  ;;  %411 = vmatprep.subr.bf16.mxu1 %v439_v8 }
  0x2f   :  { %376 = vmatpush3.bf16.msra.mxu0 %v440_v9  ;;  %419 = vmatpush3.bf16.msra.mxu1 %v440_v9 }
  0x30   :  { %377 = vmatprep.subr.bf16.mxu0 %v441_v10  ;;  %412 = vmatprep.subr.bf16.mxu1 %v441_v10 }
  0x33   :  { %378 = vmatpush3.bf16.msra.mxu0 %v442_v13  ;;  %420 = vmatpush3.bf16.msra.mxu1 %v442_v13 }
  0x34   :  { %379 = vmatprep.subr.bf16.mxu0 %v443_v14  ;;  %413 = vmatprep.subr.bf16.mxu1 %v443_v14 }
  0x37   :  { %380 = vmatpush3.bf16.msra.mxu0 %v444_v15  ;;  %421 = vmatpush3.bf16.msra.mxu1 %v444_v15 }
  0x38   :  { %381 = vmatprep.subr.bf16.mxu0 %v445_v16  ;;  %414 = vmatprep.subr.bf16.mxu1 %v445_v16 }
  0x3b   :  { %382 = vmatpush3.bf16.msra.mxu0 %v446_v17  ;;  %422 = vmatpush3.bf16.msra.mxu1 %v446_v17 }
  0x3e   :  { %275 = vmatmul.mubr.bf16.vlgmr.msra.gmra.mxu0 %v447_v18  ;;  %291 = vmatmul.mubr.bf16.vlgmr.msra.gmra.mxu1 %v450_v19 }
  0x3f   :  { %282 = vmatprep.mubr.bf16.mxu0 %v453_v20  ;;  %298 = vmatprep.mubr.bf16.mxu1 %v455_v21 }
  0x46   :  { %283 = vmatmul.mubr.bf16.gmra.mxu0 %v457_v22  ;;  %299 = vmatmul.mubr.bf16.gmra.mxu1 %v458_v23 }
  0xfe   :  { %v383_v24 = vpop.f32.mrf.mxu0  ;;  %v395_v25 = vpop.f32.mrf.mxu1 }
 0x100   :  { %v384_v26 = vpop.f32.mrf.mxu0  ;;  %v396_v27 = vpop.f32.mrf.mxu1 }
 0x101   :  { %v385_v28 = vadd.f32 %v384_v26, %v383_v24  ;;  %v397_v29 = vadd.f32 %v396_v27, %v395_v25 }
 0x102   :  { %v386_v30 = vpop.f32.mrf.mxu0  ;;  %v398_v31 = vpop.f32.mrf.mxu1 }
 0x103   :  { %315 = vst [vmem:[#allocation7] sm:$0xff] %v385_v28  ;;  %319 = vst [vmem:[#allocation7 + $0x20] sm:$0xff] %v397_v29 }
 0x104   :  { %v387_v32 = vpop.f32.mrf.mxu0  ;;  %v399_v33 = vpop.f32.mrf.mxu1 }
 0x105   :  { %v388_v34 = vadd.f32 %v387_v32, %v386_v30  ;;  %v400_v35 = vadd.f32 %v399_v33, %v398_v31 }
 0x106   :  { %v389_v36 = vpop.f32.mrf.mxu0  ;;  %v401_v37 = vpop.f32.mrf.mxu1 }
 0x107   :  { %316 = vst [vmem:[#allocation7 + $0x8] sm:$0xff] %v388_v34  ;;  %320 = vst [vmem:[#allocation7 + $0x28] sm:$0xff] %v400_v35 }
 0x108   :  { %v390_v38 = vpop.f32.mrf.mxu0  ;;  %v402_v39 = vpop.f32.mrf.mxu1 }
 0x109   :  { %v391_v40 = vadd.f32 %v390_v38, %v389_v36  ;;  %v403_v41 = vadd.f32 %v402_v39, %v401_v37 }
 0x10a   :  { %v392_v42 = vpop.f32.mrf.mxu0  ;;  %v404_v43 = vpop.f32.mrf.mxu1 }
 0x10b   :  { %317 = vst [vmem:[#allocation7 + $0x10] sm:$0xff] %v391_v40  ;;  %321 = vst [vmem:[#allocation7 + $0x30] sm:$0xff] %v403_v41 }
 0x10c   :  { %v393_v44 = vpop.f32.mrf.mxu0  ;;  %v405_v45 = vpop.f32.mrf.mxu1 }
 0x10d   :  { %v394_v46 = vadd.f32 %v393_v44, %v392_v42  ;;  %v406_v47 = vadd.f32 %v405_v45, %v404_v43 }
 0x10f   :  { %318 = vst [vmem:[#allocation7 + $0x18] sm:$0xff] %v394_v46  ;;  %322 = vst [vmem:[#allocation7 + $0x38] sm:$0xff] %v406_v47 }
 0x110   :  { %510 = shalt.err (!%p507_p0)
}
 0x111   :  { %334 = dma.vmem_to_hbm [thread:$0]  %s329_s1, 1024, %s564_s2, [#allocation4], %s526_s12, %s526_s12, %s527_s13  }
 0x112   :  { %523 = dma.done.wait [#allocation4], 1024  }
 0x113   :  { %524 = vsyncadd [#allocation4], 4294966272 }
 0x114   :  { %338 = vsyncpa [#allocation3], 1 }
 0x115   :  { %339 = vsyncpa [#allocation6], 1 }
 0x116   :  { %340 = vsyncpa [#allocation4], 1 }

</bundles_post_ra>
